<compile_context>
chip_gen: v5e
topology: v5e:2x2
jax: 0.10.0
libtpu: 0.0.40
codegen_flags: <defaults>
</compile_context>

<pallas_src>
import jax
import jax.numpy as jnp
import numpy as np
from jax.experimental import pallas as pl
from jax.experimental.pallas import tpu as pltpu


def _wnconv2d_kernel(p_ref, w_ref, s_ref, b_ref, o_ref):
    # p_ref : (1, K, Mt)    bf16  im2col patches tile (lane dim = spatial, dense)
    # w_ref : (Cout, K)     bf16  raw (un-normalized) weights
    # s_ref : (Cout, 1)     f32   per-output-channel scale g / ||v||
    # b_ref : (Cout, 1)     f32   bias
    # o_ref : (1, Cout, Mt) f32   output tile (lane-dense)
    acc = jnp.dot(w_ref[...], p_ref[0], preferred_element_type=jnp.float32)
    o_ref[0, ...] = (acc * s_ref[...] + b_ref[...]).astype(o_ref.dtype)


def _pick_lane_tile(m, max_tile=2048):
    """Largest multiple-of-128 divisor of m that is <= max_tile (else m)."""
    if m <= max_tile or m % 128 != 0:
        return m
    t = max_tile - max_tile % 128
    while t >= 128:
        if m % t == 0:
            return t
        t -= 128
    return m


def wn_conv2d(x_nchw, v, g, b, padding):
    """Forward pass of WNConv2d.  x_nchw: (N, Cin, H, W) float32."""
    N, Cin, H, W = x_nchw.shape
    Cout, _, KH, KW = v.shape
    Ho = H + 2 * padding - KH + 1
    Wo = W + 2 * padding - KW + 1
    K = KH * KW * Cin
    M = Ho * Wo

    # --- weight-norm scale (tiny, f32; zero-norm filter -> inf like PyTorch) --
    v32 = v.astype(jnp.float32)
    inv_norm = jax.lax.rsqrt(jnp.sum(v32 * v32, axis=(1, 2, 3)))           # (Cout,)
    scale = (g.reshape(Cout).astype(jnp.float32) * inv_norm).reshape(Cout, 1)
    bias = b.reshape(Cout, 1).astype(jnp.float32)

    # raw weights as (Cout, K), K ordered (kh, kw, cin); bf16 MXU operand
    w_mat = jnp.transpose(v, (0, 2, 3, 1)).reshape(Cout, K).astype(jnp.bfloat16)

    # --- im2col in the wrapper: patches (N, K, Ho*Wo), K ordered (kh, kw, cin)
    xb = x_nchw.astype(jnp.bfloat16)
    x_pad = jnp.pad(xb, ((0, 0), (0, 0), (padding, padding), (padding, padding)))
    cols = [x_pad[:, :, kh:kh + Ho, kw:kw + Wo]            # each (N, Cin, Ho, Wo)
            for kh in range(KH) for kw in range(KW)]
    patches = jnp.concatenate(cols, axis=1).reshape(N, K, M)

    Mt = _pick_lane_tile(M)
    grid = (N, M // Mt)

    out = pl.pallas_call(
        _wnconv2d_kernel,
        out_shape=jax.ShapeDtypeStruct((N, Cout, M), jnp.float32),
        grid=grid,
        in_specs=[
            pl.BlockSpec((1, K, Mt), lambda n, m: (n, 0, m)),
            pl.BlockSpec((Cout, K), lambda n, m: (0, 0)),
            pl.BlockSpec((Cout, 1), lambda n, m: (0, 0)),
            pl.BlockSpec((Cout, 1), lambda n, m: (0, 0)),
        ],
        out_specs=pl.BlockSpec((1, Cout, Mt), lambda n, m: (n, 0, m)),
        compiler_params=pltpu.CompilerParams(
            dimension_semantics=("parallel", "parallel"),
            vmem_limit_bytes=32 * 1024 * 1024,
        ),
    )(patches, w_mat, scale, bias)

    # back to PyTorch NCHW: pure reshape, no transpose
    return out.reshape(N, Cout, Ho, Wo)


if __name__ == "__main__":
    # Module config: in_channels=4, out_channels=8, kernel_size=3, padding=1, bias=True
    N, Cin, H, W = 2, 4, 16, 16
    Cout, KH, KW, PAD = 8, 3, 3, 1

    key = jax.random.PRNGKey(0)
    kx, kv, kg, kb = jax.random.split(key, 4)
    x = jax.random.normal(kx, (N, Cin, H, W), dtype=jnp.float32)
    v = jax.random.normal(kv, (Cout, Cin, KH, KW), dtype=jnp.float32) * 0.1
    g = jax.random.normal(kg, (Cout, 1, 1, 1), dtype=jnp.float32) + 1.5
    b = jax.random.normal(kb, (Cout,), dtype=jnp.float32) * 0.1

    y = jax.block_until_ready(wn_conv2d(x, v, g, b, PAD))

    # Reference: XLA conv on the same bf16-rounded operands, with the weight-norm
    # scale and bias applied in f32 (matches the kernel's math up to f32
    # accumulation order).
    xb = x.astype(jnp.bfloat16).astype(jnp.float32)
    vb = v.astype(jnp.bfloat16).astype(jnp.float32)
    inv_norm = jax.lax.rsqrt(jnp.sum(v * v, axis=(1, 2, 3)))
    y_ref = jax.lax.conv_general_dilated(
        xb, vb, window_strides=(1, 1), padding=((PAD, PAD), (PAD, PAD)),
        dimension_numbers=("NCHW", "OIHW", "NCHW"),
    ) * (g.reshape(Cout) * inv_norm).reshape(1, Cout, 1, 1) + b.reshape(1, Cout, 1, 1)

    np.testing.assert_allclose(np.asarray(y), np.asarray(y_ref), atol=2e-4, rtol=2e-4)
    print("KERNEL_OK")
</pallas_src>

<mosaic_0001>
module attributes {stable_mosaic.version = 11 : i64} {
  func.func @_wnconv2d_kernel(%arg0: i32, %arg1: i32, %arg2: memref<1x36x256xbf16, #tpu.memory_space<vmem>>, %arg3: memref<8x36xbf16, #tpu.memory_space<vmem>>, %arg4: memref<8x1xf32, #tpu.memory_space<vmem>>, %arg5: memref<8x1xf32, #tpu.memory_space<vmem>>, %arg6: memref<1x8x256xf32, #tpu.memory_space<vmem>>) attributes {dimension_semantics = [#tpu.dimension_semantics<parallel>, #tpu.dimension_semantics<parallel>], iteration_bounds = array<i64: 2, 1>, scalar_prefetch = 0 : i64, scratch_operands = 0 : i64, tpu.core_type = #tpu.core_type<tc>, window_params = [{transform_indices = @transform_0, window_bounds = array<i64: 1, 36, 256>}, {pipeline_mode = #tpu.pipeline_mode<synchronous>, transform_indices = @transform_1, window_bounds = array<i64: 8, 36>}, {pipeline_mode = #tpu.pipeline_mode<synchronous>, transform_indices = @transform_2, window_bounds = array<i64: 8, 1>}, {pipeline_mode = #tpu.pipeline_mode<synchronous>, transform_indices = @transform_3, window_bounds = array<i64: 8, 1>}, {transform_indices = @transform_4, window_bounds = array<i64: 1, 8, 256>}]} {
    %c0 = arith.constant 0 : index
    %c0_0 = arith.constant 0 : index
    %0 = vector.load %arg3[%c0, %c0_0] : memref<8x36xbf16, #tpu.memory_space<vmem>>, vector<8x36xbf16>
    %c0_1 = arith.constant 0 : index
    %c0_2 = arith.constant 0 : index
    %c0_3 = arith.constant 0 : index
    %1 = vector.load %arg2[%c0_1, %c0_2, %c0_3] : memref<1x36x256xbf16, #tpu.memory_space<vmem>>, vector<1x36x256xbf16>
    %2 = vector.shape_cast %1 : vector<1x36x256xbf16> to vector<36x256xbf16>
    %cst = arith.constant dense<0.000000e+00> : vector<8x256xf32>
    %3 = tpu.matmul %0, %2, %cst {dimension_numbers = #tpu.dot_dimension_numbers<[1], [0], [0], [1], [0, 0, 1, 1], [], []>} : vector<8x36xbf16>, vector<36x256xbf16>, vector<8x256xf32> -> vector<8x256xf32>
    %c0_4 = arith.constant 0 : index
    %c0_5 = arith.constant 0 : index
    %4 = vector.load %arg4[%c0_4, %c0_5] : memref<8x1xf32, #tpu.memory_space<vmem>>, vector<8x1xf32>
    %5 = vector.broadcast %4 : vector<8x1xf32> to vector<8x256xf32>
    %6 = arith.mulf %3, %5 : vector<8x256xf32>
    %c0_6 = arith.constant 0 : index
    %c0_7 = arith.constant 0 : index
    %7 = vector.load %arg5[%c0_6, %c0_7] : memref<8x1xf32, #tpu.memory_space<vmem>>, vector<8x1xf32>
    %8 = vector.broadcast %7 : vector<8x1xf32> to vector<8x256xf32>
    %9 = arith.addf %6, %8 : vector<8x256xf32>
    %c0_8 = arith.constant 0 : index
    %c0_9 = arith.constant 0 : index
    %c0_10 = arith.constant 0 : index
    %10 = vector.load %arg6[%c0_8, %c0_9, %c0_10] : memref<1x8x256xf32, #tpu.memory_space<vmem>>, vector<1x8x256xf32>
    %11 = vector.shape_cast %10 : vector<1x8x256xf32> to vector<8x256xf32>
    %12 = vector.shape_cast %9 : vector<8x256xf32> to vector<1x8x256xf32>
    tpu.vector_store %arg6[%c0_8, %c0_9, %c0_10], %12 {strides = array<i32>} : memref<1x8x256xf32, #tpu.memory_space<vmem>>, vector<1x8x256xf32>,
    return
  }
  func.func @transform_0(%arg0: i32, %arg1: i32) -> (i32, i32, i32) {
    %c0_i32 = arith.constant 0 : i32
    %c0_i32_0 = arith.constant 0 : i32
    return %arg0, %c0_i32, %arg1 : i32, i32, i32
  }
  func.func @transform_1(%arg0: i32, %arg1: i32) -> (i32, i32) {
    %c0_i32 = arith.constant 0 : i32
    %c0_i32_0 = arith.constant 0 : i32
    %c0_i32_1 = arith.constant 0 : i32
    return %c0_i32, %c0_i32_0 : i32, i32
  }
  func.func @transform_2(%arg0: i32, %arg1: i32) -> (i32, i32) {
    %c0_i32 = arith.constant 0 : i32
    %c0_i32_0 = arith.constant 0 : i32
    %c0_i32_1 = arith.constant 0 : i32
    return %c0_i32, %c0_i32_0 : i32, i32
  }
  func.func @transform_3(%arg0: i32, %arg1: i32) -> (i32, i32) {
    %c0_i32 = arith.constant 0 : i32
    %c0_i32_0 = arith.constant 0 : i32
    %c0_i32_1 = arith.constant 0 : i32
    return %c0_i32, %c0_i32_0 : i32, i32
  }
  func.func @transform_4(%arg0: i32, %arg1: i32) -> (i32, i32, i32) {
    %c0_i32 = arith.constant 0 : i32
    %c0_i32_0 = arith.constant 0 : i32
    return %arg0, %c0_i32, %arg1 : i32, i32, i32
  }
}

</mosaic_0001>

<bundles_post_ra>
// kernel: tpu_custom_call.1
= control target key start
LH: loop header
LB: loop body
LE: loop exit
PB: predicated region body
PF: predicated region fallthrough
CT: control target
= control target key end

     0   :  { %9 = vsyncpa [#allocation3], 0  ;;  %s714_s0 = inlined_call_operand.vmem [shape: bf16[2,36,256], index: 0, kind: input, shape index: {}]   ;;  %s715_s1 = inlined_call_operand.vmem [shape: bf16[8,36], index: 1, kind: input, shape index: {}]   ;;  %s716_s2 = inlined_call_operand.vmem [shape: f32[8,1], index: 2, kind: input, shape index: {}]   ;;  %s717_s3 = inlined_call_operand.vmem [shape: f32[8,1], index: 3, kind: input, shape index: {}]   ;;  %s718_s4 = inlined_call_operand.hbm [shape: f32[2,8,256], index: 4, kind: output, shape index: {}]  }
   0x1   :  { %11 = vsyncpa [#allocation3 + $0x1], 0  ;;  %s608_s15 = smov 0   ;;  %s610_s16 = smov 0  }
   0x2   :  { %s612_s17 = smov 0   ;;  %s614_s18 = smov 0  }
   0x3   :  { %s616_s19 = smov 0   ;;  %s618_s20 = smov 0  }
   0x4 LB: > { %s409_s21 = sadd.s32 4294967295, %s580_s20   ;;  %s410_s22 = sadd.s32 4294967294, %s580_s20   ;;  %s580_s20 = sphi %s618_s20, %s17_s20   ;;  %s576_s19 = sphi %s616_s19, %s725_s19   ;;  %s572_s18 = sphi %s614_s18, %s724_s18   ;;  %s568_s17 = sphi %s612_s17, %s723_s17   ;;  %s564_s16 = sphi %s610_s16, %s722_s16   ;;  %s560_s15 = sphi %s608_s15, %s721_s15  }
   0x5   : > { %s29_s23 = sadd.s32 1, %s576_s19  ;;  %s129_s24 = sadd.s32 1, %s568_s17 }
   0x6   : > { %p31_p0 = scmp.ge.s32.totalorder %s29_s23, 2  ;;  %p139_p1 = scmp.ne.s32.totalorder %s568_s17, %s564_s16 }
   0x7   : > { %p140_p2 = scmp.eq.s32.totalorder %s409_s21, 1  ;;  %p145_p3 = scmp.ne.s32.totalorder %s564_s16, %s560_s15 }
   0x8   : > { %s727_s23 = smov (%p31_p0, %s29_s23), 0  ;;  %p146_p5 = scmp.eq.s32.totalorder %s410_s22, 1 }
   0x9   : > { %p648_p4 = por %p140_p2, %p139_p1  ;;  %s124_s26 = ssub.s32 %s576_s19, %s727_s23 }
   0xa   : > { %p413_p6 = scmp.ge.s32.totalorder %s580_s20, 1  ;;  %p127_p7 = scmp.eq.s32.totalorder %s124_s26, 0 }
   0xb   : > { %p655_p8 = por %p146_p5, %p145_p3  ;;  %p186_p9 = scmp.lt.s32.totalorder %s580_s20, 3 }
   0xc   : > { %s661_s28 = scalar_select %p127_p7, %s568_s17, %s129_s24  }
   0xd   : > { %p187_p10 = pnand %p413_p6, %p186_p9 }
   0xe   : > { %p217_p11 = scmp.lt.s32.totalorder (!%p187_p10), %s572_s18, 1  ;;  %s213_s14 = sand.u32 (!%p187_p10), 1, %s564_s16  }
   0xf   : > { %190 = sbr.rel (%p187_p10) target bundleno = 176 (0xb0), region = 36  ;;  %s414_s21 = sshll.u32 (!%p187_p10), %s213_s14, 4 }
  0x10   : > { %s443_s22 = sshll.u32 (!%p187_p10), %s572_s18, 4  ;;  %s215_s30 = scalar_lea.vmem (!%p187_p10), [#allocation2], %s414_s21 }
  0x11   : > { %s328_s29 = scalar_lea.hbm (!%p187_p10), %s718_s4, %s443_s22  ;;  %s522_s11 = scalar_lea.hbm (!%p187_p10), %s718_s4, 32 }
  0x14   : > { %v296_v0 = vld [vmem:[%s716_s2] sm:$0xff]  ;;  %v582_v1 = vmov 0   ;;  %s218_s5 = scalar_select %p217_p11, %s572_s18, 1  ;;  %vm263_vm0 = vcmask 1041408   ;;  %vm259_vm1 = vcmask 293888  }
  0x15   : > { %501 = vset.pattern.permute.xlu0 %v582_v1  ;;  %v304_v3 = vld [vmem:[%s717_s3] sm:$0xff]  ;;  %s315_s18 = scalar_lea.sflag [#allocation3], %s213_s14 }
  0x16   : > { %299 = vperm.xlu0 %501, %v296_v0   ;;  %s444_s6 = smul.u32 40, %s218_s5  ;;  %v228_v22 = vld [vmem:[%s715_s1] sm:$0xf]  ;;  %s330_s5 = sshll.u32 %s215_s30, 4  ;;  %s331_s5 = int_to_ptr.vmem [resolvable:$true] %s330_s5 }
  0x18   : > { %s224_s9 = scalar_lea.vmem %s714_s0, %s444_s6  ;;  %s332_s6 = sshll.u32 %s328_s29, 4  ;;  %s333_s6 = int_to_ptr.hbm [resolvable:$true] %s332_s6 }
  0x19   : > { %v233_v2 = vld [vmem:[%s224_s9 + $0x20] sm:$0x33]  ;;  %v426_v6 = vld [vmem:[%s224_s9 + $0x10] sm:$0xf]  ;;  %v442_v9 = vld [vmem:[%s224_s9 + $0x14] sm:$0xf0] }
  0x1a   : > { %v247_v4 = vunpack.c.l.b16 %v233_v2  ;;  %v248_v5 = vunpack.c.h.b16 %v233_v2  ;;  %v441_v10 = vld [vmem:[%s224_s9 + $0x14] sm:$0xf]  ;;  %v428_v11 = vld [vmem:[%s224_s9 + $0x18] sm:$0xf0]  ;;  %v427_v14 = vor.u32 %v442_v9, %v426_v6  ;;  %v418_v16 = vld [vmem:[%s224_s9] sm:$0xf] }
  0x1b   : > { %v431_v15 = vor.u32 %v441_v10, %v428_v11  ;;  %v440_v17 = vld [vmem:[%s224_s9 + $0x4] sm:$0xf0]  ;;  %v439_v18 = vld [vmem:[%s224_s9 + $0x4] sm:$0xf]  ;;  %v420_v19 = vld [vmem:[%s224_s9 + $0x8] sm:$0xf0] }
  0x1c   : > { %v253_v7 = vpack.c.b16 %v247_v4, %v247_v4  ;;  %v254_v8 = vpack.c.b16 %v248_v5, %v248_v5  ;;  %v419_v20 = vor.u32 %v440_v17, %v418_v16  ;;  %v423_v21 = vor.u32 %v439_v18, %v420_v19  ;;  %s516_s7 = sshra.s32 %s333_s6, 4  ;;  %s517_s7 = int_to_ptr.hbm [resolvable:$true] %s516_s7 }
  0x1d   : > { %s518_s8 = scalar_lea.hbm %s517_s7, 16  ;;  %p523_p1 = scmp.lt.s32.totalorder %s517_s7, %s718_s4 }
  0x1e   : > { %307 = vperm.xlu0 %501, %v304_v3   ;;  %v265_v12 = vsel %vm263_vm0, %v253_v7, 0  ;;  %v268_v13 = vsel %vm263_vm0, %v254_v8, 0  ;;  %p519_p12 = scmp.ne.s32.totalorder %s517_s7, %s518_s8  ;;  %p524_p2 = scmp.lt.s32.totalorder %s522_s11, %s518_s8 }
  0x1f   : > { %275 = vmatpush.bf16.msra.mxu0 %v265_v12  ;;  %288 = vmatpush.bf16.msra.mxu1 %v268_v13 }
  0x20   : > { %p520_p13 = pnand %p519_p12, %p648_p4  ;;  %p525_p3 = por %p524_p2, %p523_p1 }
  0x22   : > { %p521_p0 = pneg %p520_p13 }
  0x23   : > { %276 = vmatpush.bf16.msra.mxu0 %v427_v14  ;;  %289 = vmatpush.bf16.msra.mxu1 %v431_v15 }
  0x24   : > { %p526_p5 = pnand %p525_p3, %p521_p0 }
  0x27   : > { %277 = vmatpush.bf16.msra.mxu0 %v419_v20  ;;  %290 = vmatpush.bf16.msra.mxu1 %v423_v21 }
  0x2a   : > { %432 = vmatmul.msk.bf16.vlgmr.msra.gmra.mxu0 %vm259_vm1, %v228_v22  ;;  %433 = vmatmul.msk.bf16.vlgmr.msra.gmra.mxu1 %vm259_vm1, %v228_v22 }
  0x88   : > { %v300_v23 = vpop.permute.xlu0 %299 }
  0x90   : > { %v308_v28 = vpop.permute.xlu0 %307 }
  0xa7   : > { %v279_v24 = vpop.f32.mrf.mxu0  ;;  %v292_v25 = vpop.f32.mrf.mxu1 }
  0xa8   : > { %v302_v26 = vmul.f32 %v300_v23, %v279_v24  ;;  %v303_v27 = vmul.f32 %v300_v23, %v292_v25 }
  0xaa   : > { %v310_v29 = vadd.f32 %v308_v28, %v302_v26  ;;  %v311_v30 = vadd.f32 %v308_v28, %v303_v27 }
  0xac   : > { %312 = vst [vmem:[%s215_s30] sm:$0xff] %v310_v29 }
  0xad   : > { %313 = vst [vmem:[%s215_s30 + $0x8] sm:$0xff] %v311_v30 }
  0xae   : > { %529 = shalt.err (!%p526_p5)
}
  0xaf   : > { %445 = dma.vmem_to_hbm [thread:$0]  (%p648_p4), %s331_s5, 256, %s333_s6, %s315_s18   ;;  %v281_v31 = vpop.f32.mrf.mxu0  ;;  %v294_v32 = vpop.f32.mrf.mxu1 }
  0xb0 PF: > { %p451_p6 = scmp.ge.s32.totalorder %s580_s20, 2  ;;  %s344_s14 = sand.u32 1, %s560_s15  }
  0xb1   : > { %s345_s21 = scalar_lea.sflag [#allocation3], %s344_s14 }
  0xb2   : > { %p448_p7 = pnand %p451_p6, %p655_p8 }
  0xb4   : > { %p449_p9 = pneg %p448_p7 }
  0xb6   : > { %555 = dma.done.wait (%p449_p9), %s345_s21, 256  }
  0xb7   : > { %557 = vsyncadd (%p449_p9), %s345_s21, 4294967040  ;;  %s17_s20 = sadd.s32 1, %s580_s20   ;;  %s721_s15 = smov %s564_s16 }
  0xb8   : > { %p14_p10 = scmp.ge.s32.totalorder %s17_s20, 4   ;;  %s722_s16 = smov %s568_s17 }
  0xb9   : > { %s723_s17 = smov %s661_s28  ;;  %s724_s18 = smov %s576_s19 }
  0xba   : > { %s725_s19 = smov %s727_s23  ;;  %16 = sbr.rel (!%p14_p10) target bundleno = 4 (0x4), region = 71 }
  0xbf   :  { %351 = vsyncpa [#allocation3], 1 }
  0xc0   :  { %353 = vsyncpa [#allocation3 + $0x1], 1 }

</bundles_post_ra>
